<compile_context>
chip_gen: v6e
topology: v6e:2x2x1
jax: 0.10.0
libtpu: 0.0.40
codegen_flags: <defaults>
</compile_context>

<pallas_src>
import functools

import jax
import jax.numpy as jnp
from jax.experimental import pallas as pl
from jax.experimental.pallas import tpu as pltpu

_LANES = 128
_PARTIAL_SUBLANES = 8


def _kd_loss_kernel(x_ref, t_ref, out_ref, *, inv_temp):
    # Load the batch tile and scale by 1/T in f32 (classes on the lane axis).
    x = x_ref[...].astype(jnp.float32) * inv_temp
    t = t_ref[...].astype(jnp.float32) * inv_temp

    # Row-wise shifted logits.
    x_shift = x - jnp.max(x, axis=1, keepdims=True)
    t_shift = t - jnp.max(t, axis=1, keepdims=True)

    x_lse = jnp.log(jnp.sum(jnp.exp(x_shift), axis=1, keepdims=True))
    t_exp = jnp.exp(t_shift)
    t_sum = jnp.sum(t_exp, axis=1, keepdims=True)

    # Fused KL per row (no full-tile log_p / log_q / q temporaries):
    #   kl_r = sum_c t_exp * (t_shift - x_shift) / t_sum + x_lse - log(t_sum)
    dot = jnp.sum(t_exp * (t_shift - x_shift), axis=1, keepdims=True)
    kl_rows = dot / t_sum + (x_lse - jnp.log(t_sum))      # (block_b, 1)

    # Per-program partial sum, written as a lane-dense block (unmasked vst);
    # the final cross-program reduction happens in the JAX wrapper.
    tile_sum = jnp.sum(kl_rows)
    out_ref[...] = jnp.broadcast_to(tile_sum, out_ref.shape).astype(jnp.float32)


def _round_up(x, m):
    return ((x + m - 1) // m) * m


def _choose_block_b(batch, num_classes, itemsize, row_align,
                    vmem_input_budget=8 * 1024 * 1024):
    # Footprint per grid step: 2 inputs x 2 pipeline buffers x block_b x C x itemsize.
    rows = vmem_input_budget // (4 * num_classes * itemsize)
    rows = max(row_align, (rows // row_align) * row_align)
    rows = min(rows, _round_up(batch, row_align))
    return rows


def kd_loss(x, t, temp_factor, *, block_b=None):
    """KD loss for [B, C] logits (f32 / bf16 / fp16). Returns a scalar float32."""
    assert x.shape == t.shape and x.ndim == 2
    B, C = x.shape
    itemsize = jnp.dtype(x.dtype).itemsize
    # Sub-32-bit dtypes pack along sublanes -> larger row-tile alignment.
    row_align = {4: 8, 2: 16, 1: 32}.get(itemsize, 8)

    if block_b is None:
        block_b = _choose_block_b(B, C, itemsize, row_align)
    else:
        block_b = max(row_align, _round_up(block_b, row_align))

    # TODO(synk): for very large class counts (C too big for a full-row VMEM
    # tile), add a class-axis grid dim with an online-softmax formulation.

    B_pad = _round_up(B, block_b)
    if B_pad != B:
        pad = B_pad - B
        x = jnp.pad(x, ((0, pad), (0, 0)))   # zero rows contribute exactly 0
        t = jnp.pad(t, ((0, pad), (0, 0)))

    grid = B_pad // block_b
    kernel = functools.partial(_kd_loss_kernel, inv_temp=1.0 / float(temp_factor))

    partials = pl.pallas_call(
        kernel,
        out_shape=jax.ShapeDtypeStruct((grid, _PARTIAL_SUBLANES, _LANES),
                                       jnp.float32),
        grid_spec=pltpu.PrefetchScalarGridSpec(
            num_scalar_prefetch=0,
            grid=(grid,),
            in_specs=[
                pl.BlockSpec((block_b, C), lambda i: (i, 0)),
                pl.BlockSpec((block_b, C), lambda i: (i, 0)),
            ],
            out_specs=pl.BlockSpec((1, _PARTIAL_SUBLANES, _LANES),
                                   lambda i: (i, 0, 0)),
        ),
        compiler_params=pltpu.CompilerParams(
            dimension_semantics=("parallel",),   # lets v7x split over 2 TCs
            vmem_limit_bytes=48 << 20,
        ),
    )(x, t)

    # Tiny final reduction + scaling (glue): * T^2 / original batch size.
    kl_sum = jnp.sum(partials[:, 0, 0])
    return kl_sum * (float(temp_factor) ** 2) / B


def _kd_loss_ref(x, t, temp_factor):
    xf = x.astype(jnp.float32)
    tf = t.astype(jnp.float32)
    log_p = jax.nn.log_softmax(xf / temp_factor, axis=1)
    q = jax.nn.softmax(tf / temp_factor, axis=1)
    log_q = jax.nn.log_softmax(tf / temp_factor, axis=1)
    kl = jnp.sum(q * (log_q - log_p))
    return kl * (temp_factor ** 2) / x.shape[0]


if __name__ == "__main__":
    temp_factor = 4.0  # deterministic "parameter" from __init__(temp_factor)

    key = jax.random.PRNGKey(0)
    k1, k2 = jax.random.split(key)
    B, C = 16, 128  # small: batch=16, num_classes=128
    student_logits = jax.random.normal(k1, (B, C), dtype=jnp.float32)
    teacher_logits = jax.random.normal(k2, (B, C), dtype=jnp.float32)

    # f32 inputs
    loss = jax.block_until_ready(kd_loss(student_logits, teacher_logits, temp_factor))
    ref = _kd_loss_ref(student_logits, teacher_logits, temp_factor)
    assert jnp.allclose(loss, ref, rtol=1e-4, atol=1e-4), (loss, ref)

    # bf16 inputs (halves HBM traffic; kernel math stays f32)
    s16 = student_logits.astype(jnp.bfloat16)
    t16 = teacher_logits.astype(jnp.bfloat16)
    loss16 = jax.block_until_ready(kd_loss(s16, t16, temp_factor))
    ref16 = _kd_loss_ref(s16, t16, temp_factor)
    assert jnp.allclose(loss16, ref16, rtol=1e-4, atol=1e-4), (loss16, ref16)

    print("KERNEL_OK")
</pallas_src>

<mosaic_0001>
module attributes {stable_mosaic.version = 11 : i64} {
  func.func @_kd_loss_kernel(%arg0: i32, %arg1: memref<16x128xf32, #tpu.memory_space<vmem>>, %arg2: memref<16x128xf32, #tpu.memory_space<vmem>>, %arg3: memref<1x8x128xf32, #tpu.memory_space<vmem>>) attributes {dimension_semantics = [#tpu.dimension_semantics<parallel>], iteration_bounds = array<i64: 1>, scalar_prefetch = 0 : i64, scratch_operands = 0 : i64, tpu.core_type = #tpu.core_type<tc>, window_params = [{transform_indices = @transform_0, window_bounds = array<i64: 16, 128>}, {transform_indices = @transform_1, window_bounds = array<i64: 16, 128>}, {transform_indices = @transform_2, window_bounds = array<i64: 1, 8, 128>}]} {
    %c0 = arith.constant 0 : index
    %c0_0 = arith.constant 0 : index
    %0 = vector.load %arg1[%c0, %c0_0] : memref<16x128xf32, #tpu.memory_space<vmem>>, vector<16x128xf32>
    %cst = arith.constant 2.500000e-01 : f32
    %1 = vector.broadcast %cst : f32 to vector<16x128xf32>
    %2 = arith.mulf %0, %1 : vector<16x128xf32>
    %c0_1 = arith.constant 0 : index
    %c0_2 = arith.constant 0 : index
    %3 = vector.load %arg2[%c0_1, %c0_2] : memref<16x128xf32, #tpu.memory_space<vmem>>, vector<16x128xf32>
    %cst_3 = arith.constant 2.500000e-01 : f32
    %4 = vector.broadcast %cst_3 : f32 to vector<16x128xf32>
    %5 = arith.mulf %3, %4 : vector<16x128xf32>
    %cst_4 = arith.constant dense<0xFF800000> : vector<16xf32>
    %6 = vector.multi_reduction <maximumf>, %2, %cst_4 [1] : vector<16x128xf32> to vector<16xf32>
    %7 = vector.shape_cast %6 : vector<16xf32> to vector<16x1xf32>
    %8 = vector.broadcast %7 : vector<16x1xf32> to vector<16x128xf32>
    %9 = arith.subf %2, %8 : vector<16x128xf32>
    %cst_5 = arith.constant dense<0xFF800000> : vector<16xf32>
    %10 = vector.multi_reduction <maximumf>, %5, %cst_5 [1] : vector<16x128xf32> to vector<16xf32>
    %11 = vector.shape_cast %10 : vector<16xf32> to vector<16x1xf32>
    %12 = vector.broadcast %11 : vector<16x1xf32> to vector<16x128xf32>
    %13 = arith.subf %5, %12 : vector<16x128xf32>
    %14 = math.exp %9 : vector<16x128xf32>
    %cst_6 = arith.constant dense<0.000000e+00> : vector<16xf32>
    %15 = vector.multi_reduction <add>, %14, %cst_6 [1] : vector<16x128xf32> to vector<16xf32>
    %16 = vector.shape_cast %15 : vector<16xf32> to vector<16x1xf32>
    %17 = math.log %16 : vector<16x1xf32>
    %18 = math.exp %13 : vector<16x128xf32>
    %cst_7 = arith.constant dense<0.000000e+00> : vector<16xf32>
    %19 = vector.multi_reduction <add>, %18, %cst_7 [1] : vector<16x128xf32> to vector<16xf32>
    %20 = vector.shape_cast %19 : vector<16xf32> to vector<16x1xf32>
    %21 = arith.subf %13, %9 : vector<16x128xf32>
    %22 = arith.mulf %18, %21 : vector<16x128xf32>
    %cst_8 = arith.constant dense<0.000000e+00> : vector<16xf32>
    %23 = vector.multi_reduction <add>, %22, %cst_8 [1] : vector<16x128xf32> to vector<16xf32>
    %24 = vector.shape_cast %23 : vector<16xf32> to vector<16x1xf32>
    %25 = arith.divf %24, %20 : vector<16x1xf32>
    %26 = math.log %20 : vector<16x1xf32>
    %27 = arith.subf %17, %26 : vector<16x1xf32>
    %28 = arith.addf %25, %27 : vector<16x1xf32>
    %29 = vector.shape_cast %28 : vector<16x1xf32> to vector<1x16x1xf32>
    %cst_9 = arith.constant dense<0.000000e+00> : vector<1xf32>
    %30 = vector.multi_reduction <add>, %29, %cst_9 [1, 2] : vector<1x16x1xf32> to vector<1xf32>
    %31 = vector.shape_cast %30 : vector<1xf32> to vector<1x1x1xf32>
    %32 = vector.extract %31[0, 0, 0] : f32 from vector<1x1x1xf32>
    %33 = vector.broadcast %32 : f32 to vector<1x8x128xf32>
    %c0_10 = arith.constant 0 : index
    %c0_11 = arith.constant 0 : index
    %c0_12 = arith.constant 0 : index
    %34 = vector.load %arg3[%c0_10, %c0_11, %c0_12] : memref<1x8x128xf32, #tpu.memory_space<vmem>>, vector<1x8x128xf32>
    tpu.vector_store %arg3[%c0_10, %c0_11, %c0_12], %33 {strides = array<i32>} : memref<1x8x128xf32, #tpu.memory_space<vmem>>, vector<1x8x128xf32>,
    return
  }
  func.func @transform_0(%arg0: i32) -> (i32, i32) {
    %c0_i32 = arith.constant 0 : i32
    %c0_i32_0 = arith.constant 0 : i32
    return %arg0, %c0_i32 : i32, i32
  }
  func.func @transform_1(%arg0: i32) -> (i32, i32) {
    %c0_i32 = arith.constant 0 : i32
    %c0_i32_0 = arith.constant 0 : i32
    return %arg0, %c0_i32 : i32, i32
  }
  func.func @transform_2(%arg0: i32) -> (i32, i32, i32) {
    %c0_i32 = arith.constant 0 : i32
    %c0_i32_0 = arith.constant 0 : i32
    %c0_i32_1 = arith.constant 0 : i32
    return %arg0, %c0_i32, %c0_i32_0 : i32, i32, i32
  }
}

</mosaic_0001>

<bundles_post_ra>
// kernel: tpu_custom_call.1
= control target key start
LH: loop header
LB: loop body
LE: loop exit
PB: predicated region body
PF: predicated region fallthrough
CT: control target
= control target key end

     0   :  { %7 = vsyncpa [#allocation3], 0  ;;  %s253_s0 = inlined_call_operand.hbm [shape: f32[16,128], index: 0, kind: input, shape index: {}]   ;;  %s254_s1 = inlined_call_operand.hbm [shape: f32[16,128], index: 1, kind: input, shape index: {}]   ;;  %s255_s2 = inlined_call_operand.hbm [shape: f32[1,8,128], index: 2, kind: output, shape index: {}]  }
   0x1   :  { %8 = vsyncpa [#allocation6], 0 }
   0x2   :  { %9 = vsyncpa [#allocation4], 0  ;;  %s224_s9 = smov [#allocation2]  }
   0x3   :  { %s15_s10 = sshll.u32 %s224_s9, 4  ;;  %s16_s10 = int_to_ptr.vmem [resolvable:$true] %s15_s10 }
   0x4   :  { %s166_s11 = scalar_lea.vmem %s16_s10, 256  ;;  %p171_p1 = scmp.lt.s32.totalorder %s16_s10, %s16_s10 }
   0x5   :  { %p167_p0 = scmp.ne.s32.totalorder %s16_s10, %s166_s11  ;;  %p172_p2 = scmp.lt.s32.totalorder %s166_s11, %s166_s11 }
   0x7   :  { %p173_p3 = por %p172_p2, %p171_p1 }
   0x9   :  { %p174_p4 = pnand %p173_p3, %p167_p0 }
   0xb   :  { %177 = shalt.err (!%p174_p4)
}
   0xc   :  { %s225_s12 = smov 128   ;;  %s226_s13 = smov 8  }
   0xd   :  { %21 = dma.hbm_to_vmem [thread:$0]  %s253_s0, 256, %s16_s10, [#allocation3], %s225_s12, %s225_s12, %s226_s13  }
   0xe   :  { %s227_s16 = smov [#allocation5]  }
   0xf   :  { %s27_s17 = sshll.u32 %s227_s16, 4  ;;  %s28_s17 = int_to_ptr.vmem [resolvable:$true] %s27_s17 }
  0x10   :  { %s186_s18 = scalar_lea.vmem %s28_s17, 256  ;;  %p191_p6 = scmp.lt.s32.totalorder %s28_s17, %s28_s17 }
  0x11   :  { %p187_p5 = scmp.ne.s32.totalorder %s28_s17, %s186_s18  ;;  %p192_p7 = scmp.lt.s32.totalorder %s186_s18, %s186_s18 }
  0x13   :  { %p193_p8 = por %p192_p7, %p191_p6 }
  0x15   :  { %p194_p9 = pnand %p193_p8, %p187_p5 }
  0x17   :  { %197 = shalt.err (!%p194_p9)
}
  0x18   :  { %33 = dma.hbm_to_vmem [thread:$0]  %s254_s1, 256, %s28_s17, [#allocation6], %s225_s12, %s225_s12, %s226_s13  }
  0x19   :  { %218 = dma.done.wait [#allocation3], 256  }
  0x1a   :  { %219 = vsyncadd [#allocation3], 4294967040 }
  0x1b   :  { %220 = dma.done.wait [#allocation6], 256  }
  0x1c   :  { %221 = vsyncadd [#allocation6], 4294967040  ;;  %v44_v0 = vld [vmem:[#allocation5] sm:$0xff]  ;;  %v40_v1 = vld [vmem:[#allocation2] sm:$0xff]  ;;  %vm100_vm0 = vcmask 7168   ;;  %s228_s0 = smov [#allocation7]  }
  0x1d   :  { %v45_v2 = vld [vmem:[#allocation5 + $0x8] sm:$0xff]  ;;  %v46_v3 = vmul.f32 0.25, %v44_v0  ;;  %v42_v4 = vmul.f32 0.25, %v40_v1  ;;  %v41_v5 = vld [vmem:[#allocation2 + $0x8] sm:$0xff]  ;;  %s121_s1 = sshll.u32 %s228_s0, 4  ;;  %s122_s1 = int_to_ptr.vmem [resolvable:$true] %s121_s1 }
  0x1e   :  { %v47_v6 = vmul.f32 0.25, %v45_v2  ;;  %v43_v7 = vmul.f32 0.25, %v41_v5  ;;  %s198_s22 = scalar_lea.vmem %s122_s1, 128  ;;  %p203_p11 = scmp.lt.s32.totalorder %s122_s1, %s122_s1 }
  0x1f   :  { %54 = vmax.xlane.f32.xlu1 %v46_v3  ;;  %48 = vmax.xlane.f32.xlu0 %v42_v4  ;;  %p199_p10 = scmp.ne.s32.totalorder %s122_s1, %s198_s22  ;;  %p204_p12 = scmp.lt.s32.totalorder %s198_s22, %s198_s22 }
  0x21   :  { %p205_p13 = por %p204_p12, %p203_p11 }
  0x23   :  { %56 = vmax.xlane.f32.xlu1 %v47_v6  ;;  %50 = vmax.xlane.f32.xlu0 %v43_v7  ;;  %p206_p0 = pnand %p205_p13, %p199_p10 }
  0xa8   :  { %v55_v8 = vpop.xlane.xlu1 %54  ;;  %v49_v9 = vpop.xlane.xlu0 %48 }
  0xa9   :  { %v58_v10 = vsub.f32 %v46_v3, %v55_v8  ;;  %v52_v11 = vsub.f32 %v42_v4, %v49_v9 }
  0xab   :  { %v60_v12 = vmul.f32 1.442695, %v52_v11  ;;  %v72_v15 = vmul.f32 1.442695, %v58_v10  ;;  %v80_v23 = vsub.f32 %v58_v10, %v52_v11 }
  0xac   :  { %v57_v13 = vpop.xlane.xlu1 %56  ;;  %v51_v14 = vpop.xlane.xlu0 %50 }
  0xad   :  { %v53_v16 = vsub.f32 %v43_v7, %v51_v14  ;;  %138 = vpow2.f32 %v60_v12  ;;  %v59_v17 = vsub.f32 %v47_v6, %v57_v13 }
  0xae   :  { %140 = vpow2.f32 %v72_v15 }
  0xaf   :  { %v62_v18 = vmul.f32 1.442695, %v53_v16  ;;  %v74_v19 = vmul.f32 1.442695, %v59_v17  ;;  %v81_v26 = vsub.f32 %v59_v17, %v53_v16 }
  0xb1   :  { %142 = vpow2.f32 %v62_v18 }
  0xb2   :  { %144 = vpow2.f32 %v74_v19 }
  0xba   :  { %v139_v20 = vpop.eup %138 }
  0xbb   :  { %64 = vadd.xlane.f32.xlu0 %v139_v20  ;;  %v141_v21 = vpop.eup %140 }
  0xbc   :  { %v82_v24 = vmul.f32 %v141_v21, %v80_v23 }
  0xbe   :  { %v143_v22 = vpop.eup %142 }
  0xbf   :  { %76 = vadd.xlane.f32.xlu0 %v141_v21  ;;  %66 = vadd.xlane.f32.xlu1 %v143_v22  ;;  %v145_v25 = vpop.eup %144 }
  0xc0   :  { %v83_v27 = vmul.f32 %v145_v25, %v81_v26 }
  0xc3   :  { %84 = vadd.xlane.f32.xlu0 %v82_v24  ;;  %78 = vadd.xlane.f32.xlu1 %v145_v25 }
  0xc7   :  { %86 = vadd.xlane.f32.xlu1 %v83_v27 }
 0x144   :  { %v65_v28 = vpop.xlane.xlu0 %64 }
 0x145   :  { %146 = vlog2.f32 %v65_v28 }
 0x148   :  { %v67_v29 = vpop.xlane.xlu1 %66  ;;  %v77_v30 = vpop.xlane.xlu0 %76 }
 0x149   :  { %148 = vlog2.f32 %v67_v29 }
 0x14a   :  { %150 = vlog2.f32 %v77_v30 }
 0x14b   :  { %152 = vrcp.f32 %v77_v30 }
 0x14c   :  { %v79_v31 = vpop.xlane.xlu1 %78  ;;  %v85_v41 = vpop.xlane.xlu0 %84 }
 0x14d   :  { %154 = vrcp.f32 %v79_v31 }
 0x14e   :  { %156 = vlog2.f32 %v79_v31 }
 0x150   :  { %v87_v45 = vpop.xlane.xlu1 %86 }
 0x152   :  { %v147_v32 = vpop.eup %146 }
 0x153   :  { %v69_v36 = vmul.f32 0.6931472, %v147_v32 }
 0x156   :  { %v149_v33 = vpop.eup %148 }
 0x157   :  { %v151_v34 = vpop.eup %150  ;;  %v71_v42 = vmul.f32 0.6931472, %v149_v33 }
 0x158   :  { %v153_v35 = vpop.eup %152  ;;  %v93_v37 = vmul.f32 0.6931472, %v151_v34 }
 0x159   :  { %v89_v44 = vmul.f32 %v153_v35, %v85_v41 }
 0x15a   :  { %v155_v38 = vpop.eup %154  ;;  %v96_v40 = vsub.f32 %v69_v36, %v93_v37 }
 0x15b   :  { %v157_v39 = vpop.eup %156  ;;  %v91_v48 = vmul.f32 %v155_v38, %v87_v45 }
 0x15c   :  { %v95_v43 = vmul.f32 0.6931472, %v157_v39  ;;  %v98_v46 = vadd.f32 %v96_v40, %v89_v44 }
 0x15e   :  { %v97_v47 = vsub.f32 %v71_v42, %v95_v43  ;;  %v101_v50 = vsel %vm100_vm0, %v98_v46, 0.0 }
 0x160   :  { %v99_v49 = vadd.f32 %v97_v47, %v91_v48 }
 0x162   :  { %v102_v51 = vsel %vm100_vm0, %v99_v49, 0.0 }
 0x163   :  { %v103_v52 = vadd.f32 %v102_v51, %v101_v50 }
 0x165   :  { %104 = vadd.xlane.f32.xlu0 %v103_v52 }
 0x1ee   :  { %v105_v53 = vpop.xlane.xlu0 %104 }
 0x1ef   :  { %v106_v54 = vrot.slane %v105_v53, 4 }
 0x1f1   :  { %v107_v55 = vadd.f32 %v106_v54, %v105_v53 }
 0x1f3   :  { %v108_v56 = vrot.slane %v107_v55, 2 }
 0x1f5   :  { %v109_v57 = vadd.f32 %v108_v56, %v107_v55 }
 0x1f7   :  { %v110_v58 = vrot.slane %v109_v57, 1 }
 0x1f9   :  { %v111_v59 = vadd.f32 %v110_v58, %v109_v57 }
 0x1fb   :  { %131 = vpush %v111_v59 }
 0x22c   :  { %s132_s21 = spop %131 }
 0x22d   :  { %v113_v60 = vstv %s132_s21 }
 0x22e   :  { %114 = vst [vmem:[#allocation7] sm:$0xff] %v113_v60 }
 0x22f   :  { %209 = shalt.err (!%p206_p0)
}
 0x230   :  { %124 = dma.vmem_to_hbm [thread:$0]  %s122_s1, 128, %s255_s2, [#allocation4]  }
 0x231   :  { %222 = dma.done.wait [#allocation4], 128  }
 0x232   :  { %223 = vsyncadd [#allocation4], 4294967168 }
 0x233   :  { %128 = vsyncpa [#allocation3], 1 }
 0x234   :  { %129 = vsyncpa [#allocation6], 1 }
 0x235   :  { %130 = vsyncpa [#allocation4], 1 }

</bundles_post_ra>
